<compile_context>
chip_gen: v6e
topology: v6e:2x2x1
jax: 0.10.0
libtpu: 0.0.40
codegen_flags: <defaults>
</compile_context>

<pallas_src>
import jax
import jax.numpy as jnp
from jax import lax
from jax.experimental import pallas as pl
from jax.experimental.pallas import tpu as pltpu

# ---- small stand-in sizes (original: C_in=2048, NC=80, HID=1024, HW=14*14) ----
B = 4            # total batch
BB = 2           # samples per grid step -> grid = (B // BB,) = (2,) parallel steps
C_IN = 32
H = W = 8
HW = H * W
NC = 8           # num_classes
HID = 32         # hidden_dim of conv1 / GroupWiseLinear
KMAX = max(1, int(round(0.1 * HW)))    # TopKMaxPooling(kmax=0.1)
TOPK_MASK = max(1, NC // 4)            # analogue of torch.topk(pred, 20) for 80 classes
BBNC = BB * NC

# Python-int constants ONLY (jnp-array constants would be captured by the kernel).
LANE_BITS = max(1, (HW - 1).bit_length())
LOW_MASK = (1 << LANE_BITS) - 1
SENTINEL = -(1 << 31)                  # int32 min; strictly below any finite packed key


def lrformer_kernel(x_ref, wb_ref, wct_ref, bc_ref, bnsc_ref, bnsh_ref,
                    wg_ref, bg_ref, out_ref):
    # x_ref block: (BB, C_IN, HW) bf16; x_ref[b] is a free (C_IN, HW) ref view.
    wb = wb_ref[...]                                        # (NC, C_IN) bf16

    lg_list, ssum_list, a_list = [], [], []
    for b in range(BB):                                     # static, small
        xb = x_ref[b]                                       # (C_IN, HW) bf16
        # base_cls 1x1 conv (no bias) -> (NC, HW) f32
        lg = jnp.dot(wb, xb, preferred_element_type=jnp.float32)
        # sigmoid spatial attention (f32: v5e has no bf16 VPU/EUP)
        sm = jax.nn.sigmoid(lg)
        lg_list.append(lg)
        ssum_list.append(jnp.sum(sm, axis=-1, keepdims=True))          # (NC, 1)
        # A_b = sm @ xb^T : (NC, C_IN), contraction over HW (reassociated conv1)
        a_list.append(
            lax.dot_general(sm.astype(jnp.bfloat16), xb,
                            (((1,), (1,)), ((), ())),
                            preferred_element_type=jnp.float32))

    # Stack along sublanes (NC is a multiple of 8 -> aligned, cheap).
    LG = jnp.concatenate(lg_list, axis=0)       # (BB*NC, HW)   f32
    A = jnp.concatenate(a_list, axis=0)         # (BB*NC, C_IN) f32
    ssum = jnp.concatenate(ssum_list, axis=0)   # (BB*NC, 1)    f32

    # ---- TopKMaxPooling(kmax=0.1): mean of top-KMAX along HW, all BB*NC rows at once.
    # Pack a monotone int32 ordering key (value high bits | lane id) so ONE max
    # reduction per knock step yields value+position; exactly one element is knocked
    # per step (full-key equality). Assumes finite logits (no NaN/inf); values that
    # agree in all but the low LANE_BITS mantissa bits are tie-broken by lane.
    bits = lax.bitcast_convert_type(LG, jnp.int32)
    okey = jnp.where(bits < 0, bits ^ 0x7FFFFFFF, bits)     # monotone in the f32 value
    lane = lax.broadcasted_iota(jnp.int32, (BBNC, HW), 1)
    key = (okey & ~LOW_MASK) | ((HW - 1) - lane)

    def knock(_, wk):
        mx = jnp.max(wk, axis=-1, keepdims=True)            # 1 XLU reduce / step
        return jnp.where(wk == mx, SENTINEL, wk)

    wk = lax.fori_loop(0, KMAX, knock, key, unroll=True)
    topk_sum = jnp.sum(jnp.where(wk == SENTINEL, LG, 0.0), axis=-1, keepdims=True)
    score1 = topk_sum * (1.0 / KMAX)                        # (BB*NC, 1)

    # ---- ONE batched matmul for the dominant contraction (M = BB*NC rows on MXU):
    #   v = A @ wc^T + (sum_h sigmoid) * bc
    v = jnp.dot(A.astype(jnp.bfloat16), wct_ref[...],
                preferred_element_type=jnp.float32)         # (BB*NC, HID)
    v = v + ssum * bc_ref[...]

    # ---- BatchNorm (inference, folded); vit == identity ----
    z = v * bnsc_ref[...] + bnsh_ref[...]

    # ---- GroupWiseLinear: per-class dot with its own weight row (bias added below) ----
    score2 = jnp.sum(wg_ref[...] * z, axis=-1, keepdims=True)          # (BB*NC, 1)

    col = score1 + score2                                   # (BB*NC, 1)

    # Column -> lane-dense row without reshape/transpose relayouts:
    # broadcast the column across lanes, keep the diagonal, reduce over sublanes.
    r = lax.broadcasted_iota(jnp.int32, (BBNC, BBNC), 0)
    c = lax.broadcasted_iota(jnp.int32, (BBNC, BBNC), 1)
    row = jnp.sum(jnp.where(r == c, col, 0.0), axis=0, keepdims=True)  # (1, BB*NC)

    out_ref[...] = ((row + bg_ref[...]) * 0.5).reshape(1, 1, BBNC)


def lrformer_forward(x_feat, params):
    """x_feat: (B, C_IN, H*W) float32  ->  cls_score: (B, NC) float32."""
    wb, wc, bc, bn_scale, bn_shift, wg, bg = params
    # One-time layout plumbing (no wrapper-side transpose of the feature map):
    x_b = x_feat.astype(jnp.bfloat16)                 # (B, C_IN, HW)
    wb_b = wb.astype(jnp.bfloat16)                    # (NC, C_IN)
    wct_b = jnp.transpose(wc).astype(jnp.bfloat16)    # (C_IN, HID)  conv1 W^T
    wg_full = jnp.tile(wg, (BB, 1))                   # (BB*NC, HID) replicated per sample
    bg_row = jnp.tile(bg, (1, BB))                    # (1, BB*NC)   lane-dense bias row

    out = pl.pallas_call(
        lrformer_kernel,
        out_shape=jax.ShapeDtypeStruct((B // BB, 1, BBNC), jnp.float32),
        grid_spec=pltpu.PrefetchScalarGridSpec(
            num_scalar_prefetch=0,
            grid=(B // BB,),
            in_specs=[
                pl.BlockSpec((BB, C_IN, HW), lambda s: (s, 0, 0)),   # x (BB samples)
                pl.BlockSpec((NC, C_IN),     lambda s: (0, 0)),      # base_cls W (bf16)
                pl.BlockSpec((C_IN, HID),    lambda s: (0, 0)),      # conv1 W^T (bf16)
                pl.BlockSpec((1, HID),       lambda s: (0, 0)),      # conv1 bias
                pl.BlockSpec((1, HID),       lambda s: (0, 0)),      # bn scale
                pl.BlockSpec((1, HID),       lambda s: (0, 0)),      # bn shift
                pl.BlockSpec((BBNC, HID),    lambda s: (0, 0)),      # GroupWiseLinear W
                pl.BlockSpec((1, BBNC),      lambda s: (0, 0)),      # GroupWiseLinear b
            ],
            out_specs=pl.BlockSpec((1, 1, BBNC), lambda s: (s, 0, 0)),
        ),
        compiler_params=pltpu.CompilerParams(
            dimension_semantics=("parallel",),     # >=2 steps -> both v7x TCs busy
            vmem_limit_bytes=32 * 1024 * 1024,     # headroom vs v7x's 64 MiB/TC
        ),
    )(x_b, wb_b, wct_b, bc, bn_scale, bn_shift, wg_full, bg_row)
    return out.reshape(B, NC)


def generate_mask(pred):
    """Plain-JAX glue equivalent of LRFormer.generate_mask (consumed only by vit)."""
    _, top_ind = lax.top_k(pred, TOPK_MASK)                              # (B, TOPK_MASK)
    onehot = jnp.sum(jax.nn.one_hot(top_ind, NC, dtype=jnp.float32), axis=1)
    row = onehot[:, :, None]
    col = onehot[:, None, :]
    return jnp.clip(row + col, 0.0, 1.0)                                 # (B, NC, NC)


def reference_forward(x_feat, params):
    """Pure-JAX reference with the original (non-reassociated) module math, using the
    same bf16 operand precision the kernel feeds to the MXU."""
    wb, wc, bc, bn_scale, bn_shift, wg, bg = params
    xb = x_feat.astype(jnp.bfloat16)
    wbb = wb.astype(jnp.bfloat16)
    wcb = wc.astype(jnp.bfloat16)
    logits = jnp.einsum('nc,bch->bnh', wbb, xb,
                        preferred_element_type=jnp.float32)              # (B, NC, HW)
    topv, _ = lax.top_k(logits, KMAX)
    score1 = topv.sum(-1) / float(KMAX)                                  # (B, NC)
    smask = jax.nn.sigmoid(logits)
    xc = jnp.einsum('oc,bch->boh', wcb, xb,
                    preferred_element_type=jnp.float32) + bc[0][None, :, None]
    v = jnp.einsum('bnh,boh->bno', smask, xc)                            # (B, NC, HID)
    vbn = v * bn_scale[0][None, None, :] + bn_shift[0][None, None, :]
    z = vbn                                                              # vit == identity
    score2 = jnp.sum(wg[None] * z, axis=-1) + bg[0][None, :]
    return (score1 + score2) / 2.0


def init_params(key):
    k = jax.random.split(key, 8)
    wb = jax.random.normal(k[0], (NC, C_IN), jnp.float32) * 0.05     # base_cls (no bias)
    wc = jax.random.normal(k[1], (HID, C_IN), jnp.float32) * 0.05    # conv1 weight
    bc = jax.random.normal(k[2], (1, HID), jnp.float32) * 0.05       # conv1 bias
    # folded inference BatchNorm(HID)
    gamma = 1.0 + 0.1 * jax.random.normal(k[3], (HID,), jnp.float32)
    beta = 0.1 * jax.random.normal(k[4], (HID,), jnp.float32)
    run_mean = 0.1 * jax.random.normal(k[5], (HID,), jnp.float32)
    run_var = jnp.abs(1.0 + 0.1 * jax.random.normal(k[6], (HID,), jnp.float32))
    inv_std = gamma / jnp.sqrt(run_var + 1e-5)
    bn_scale = inv_std.reshape(1, HID)
    bn_shift = (beta - run_mean * inv_std).reshape(1, HID)
    # GroupWiseLinear(NC, HID): uniform(-stdv, stdv), stdv = 1/sqrt(HID)
    stdv = 1.0 / (HID ** 0.5)
    kg, kb = jax.random.split(k[7])
    wg = jax.random.uniform(kg, (NC, HID), jnp.float32, -stdv, stdv)
    bg = jax.random.uniform(kb, (1, NC), jnp.float32, -stdv, stdv)
    return (wb, wc, bc, bn_scale, bn_shift, wg, bg)


if __name__ == "__main__":
    key = jax.random.PRNGKey(0)
    kx, kp = jax.random.split(key)
    # backbone final feature map, flattened NCHW -> (B, C_IN, H*W)
    x_feat = jax.random.normal(kx, (B, C_IN, HW), jnp.float32)
    params = init_params(kp)

    out = jax.block_until_ready(lrformer_forward(x_feat, params))
    ref = jax.block_until_ready(reference_forward(x_feat, params))

    # glue-side mask (only used by the external vit, which is identity here)
    _ = jax.block_until_ready(generate_mask(out))

    assert out.shape == (B, NC)
    # bf16 MXU operands + reassociated conv1 -> loosened tolerance vs the reference
    assert jnp.allclose(out, ref, atol=5e-2, rtol=5e-2), (out, ref)
    print("KERNEL_OK")
</pallas_src>

<mosaic_0001>
module attributes {stable_mosaic.version = 11 : i64} {
  func.func @lrformer_kernel(%arg0: i32, %arg1: memref<2x32x64xbf16, #tpu.memory_space<vmem>>, %arg2: memref<8x32xbf16, #tpu.memory_space<vmem>>, %arg3: memref<32x32xbf16, #tpu.memory_space<vmem>>, %arg4: memref<1x32xf32, #tpu.memory_space<vmem>>, %arg5: memref<1x32xf32, #tpu.memory_space<vmem>>, %arg6: memref<1x32xf32, #tpu.memory_space<vmem>>, %arg7: memref<16x32xf32, #tpu.memory_space<vmem>>, %arg8: memref<1x16xf32, #tpu.memory_space<vmem>>, %arg9: memref<1x1x16xf32, #tpu.memory_space<vmem>>) attributes {dimension_semantics = [#tpu.dimension_semantics<parallel>], iteration_bounds = array<i64: 2>, scalar_prefetch = 0 : i64, scratch_operands = 0 : i64, tpu.core_type = #tpu.core_type<tc>, window_params = [{transform_indices = @transform_0, window_bounds = array<i64: 2, 32, 64>}, {pipeline_mode = #tpu.pipeline_mode<synchronous>, transform_indices = @transform_1, window_bounds = array<i64: 8, 32>}, {pipeline_mode = #tpu.pipeline_mode<synchronous>, transform_indices = @transform_2, window_bounds = array<i64: 32, 32>}, {pipeline_mode = #tpu.pipeline_mode<synchronous>, transform_indices = @transform_3, window_bounds = array<i64: 1, 32>}, {pipeline_mode = #tpu.pipeline_mode<synchronous>, transform_indices = @transform_4, window_bounds = array<i64: 1, 32>}, {pipeline_mode = #tpu.pipeline_mode<synchronous>, transform_indices = @transform_5, window_bounds = array<i64: 1, 32>}, {pipeline_mode = #tpu.pipeline_mode<synchronous>, transform_indices = @transform_6, window_bounds = array<i64: 16, 32>}, {pipeline_mode = #tpu.pipeline_mode<synchronous>, transform_indices = @transform_7, window_bounds = array<i64: 1, 16>}, {transform_indices = @transform_8, window_bounds = array<i64: 1, 1, 16>}]} {
    %c0 = arith.constant 0 : index
    %c0_0 = arith.constant 0 : index
    %0 = vector.load %arg2[%c0, %c0_0] : memref<8x32xbf16, #tpu.memory_space<vmem>>, vector<8x32xbf16>
    %c0_1 = arith.constant 0 : index
    %c0_2 = arith.constant 0 : index
    %c0_3 = arith.constant 0 : index
    %1 = vector.load %arg1[%c0_1, %c0_2, %c0_3] : memref<2x32x64xbf16, #tpu.memory_space<vmem>>, vector<1x32x64xbf16>
    %2 = vector.shape_cast %1 : vector<1x32x64xbf16> to vector<32x64xbf16>
    %cst = arith.constant dense<0.000000e+00> : vector<8x64xf32>
    %3 = tpu.matmul %0, %2, %cst {dimension_numbers = #tpu.dot_dimension_numbers<[1], [0], [0], [1], [0, 0, 1, 1], [], []>} : vector<8x32xbf16>, vector<32x64xbf16>, vector<8x64xf32> -> vector<8x64xf32>
    %4 = arith.negf %3 : vector<8x64xf32>
    %5 = math.exp %4 : vector<8x64xf32>
    %cst_4 = arith.constant 1.000000e+00 : f32
    %6 = vector.broadcast %cst_4 : f32 to vector<8x64xf32>
    %7 = arith.addf %6, %5 : vector<8x64xf32>
    %8 = arith.divf %6, %7 : vector<8x64xf32>
    %cst_5 = arith.constant dense<0.000000e+00> : vector<8xf32>
    %9 = vector.multi_reduction <add>, %8, %cst_5 [1] : vector<8x64xf32> to vector<8xf32>
    %10 = vector.shape_cast %9 : vector<8xf32> to vector<8x1xf32>
    %11 = arith.truncf %8 : vector<8x64xf32> to vector<8x64xbf16>
    %cst_6 = arith.constant dense<0.000000e+00> : vector<8x32xf32>
    %12 = tpu.matmul %11, %2, %cst_6 {dimension_numbers = #tpu.dot_dimension_numbers<[1], [1], [0], [0], [0, 0, 1, 0], [], []>} : vector<8x64xbf16>, vector<32x64xbf16>, vector<8x32xf32> -> vector<8x32xf32>
    %c1 = arith.constant 1 : index
    %c0_7 = arith.constant 0 : index
    %c0_8 = arith.constant 0 : index
    %13 = vector.load %arg1[%c1, %c0_7, %c0_8] : memref<2x32x64xbf16, #tpu.memory_space<vmem>>, vector<1x32x64xbf16>
    %14 = vector.shape_cast %13 : vector<1x32x64xbf16> to vector<32x64xbf16>
    %cst_9 = arith.constant dense<0.000000e+00> : vector<8x64xf32>
    %15 = tpu.matmul %0, %14, %cst_9 {dimension_numbers = #tpu.dot_dimension_numbers<[1], [0], [0], [1], [0, 0, 1, 1], [], []>} : vector<8x32xbf16>, vector<32x64xbf16>, vector<8x64xf32> -> vector<8x64xf32>
    %16 = arith.negf %15 : vector<8x64xf32>
    %17 = math.exp %16 : vector<8x64xf32>
    %cst_10 = arith.constant 1.000000e+00 : f32
    %18 = vector.broadcast %cst_10 : f32 to vector<8x64xf32>
    %19 = arith.addf %18, %17 : vector<8x64xf32>
    %20 = arith.divf %18, %19 : vector<8x64xf32>
    %cst_11 = arith.constant dense<0.000000e+00> : vector<8xf32>
    %21 = vector.multi_reduction <add>, %20, %cst_11 [1] : vector<8x64xf32> to vector<8xf32>
    %22 = vector.shape_cast %21 : vector<8xf32> to vector<8x1xf32>
    %23 = arith.truncf %20 : vector<8x64xf32> to vector<8x64xbf16>
    %cst_12 = arith.constant dense<0.000000e+00> : vector<8x32xf32>
    %24 = tpu.matmul %23, %14, %cst_12 {dimension_numbers = #tpu.dot_dimension_numbers<[1], [1], [0], [0], [0, 0, 1, 0], [], []>} : vector<8x64xbf16>, vector<32x64xbf16>, vector<8x32xf32> -> vector<8x32xf32>
    %25 = tpu.concatenate %3, %15 in 0 : vector<8x64xf32>, vector<8x64xf32> -> vector<16x64xf32>
    %26 = tpu.concatenate %12, %24 in 0 : vector<8x32xf32>, vector<8x32xf32> -> vector<16x32xf32>
    %27 = tpu.concatenate %10, %22 in 0 : vector<8x1xf32>, vector<8x1xf32> -> vector<16x1xf32>
    %28 = tpu.bitcast %25 : vector<16x64xf32> -> vector<16x64xi32>
    %c0_i32 = arith.constant 0 : i32
    %29 = vector.broadcast %c0_i32 : i32 to vector<16x64xi32>
    %30 = arith.cmpi slt, %28, %29 : vector<16x64xi32>
    %c2147483647_i32 = arith.constant 2147483647 : i32
    %31 = vector.broadcast %c2147483647_i32 : i32 to vector<16x64xi32>
    %32 = arith.xori %28, %31 : vector<16x64xi32>
    %33 = arith.select %30, %32, %28 : vector<16x64xi1>, vector<16x64xi32>
    %34 = tpu.iota {dimensions = array<i32: 1>} : vector<16x64xi32>
    %c-64_i32 = arith.constant -64 : i32
    %35 = vector.broadcast %c-64_i32 : i32 to vector<16x64xi32>
    %36 = arith.andi %33, %35 : vector<16x64xi32>
    %c63_i32 = arith.constant 63 : i32
    %37 = vector.broadcast %c63_i32 : i32 to vector<16x64xi32>
    %38 = arith.subi %37, %34 : vector<16x64xi32>
    %39 = arith.ori %36, %38 : vector<16x64xi32>
    %c0_i32_13 = arith.constant 0 : i32
    %cst_14 = arith.constant dense<-2147483648> : vector<16xi32>
    %40 = vector.multi_reduction <maxsi>, %39, %cst_14 [1] : vector<16x64xi32> to vector<16xi32>
    %41 = vector.shape_cast %40 : vector<16xi32> to vector<16x1xi32>
    %42 = vector.broadcast %41 : vector<16x1xi32> to vector<16x64xi32>
    %43 = arith.cmpi eq, %39, %42 : vector<16x64xi32>
    %c-2147483648_i32 = arith.constant -2147483648 : i32
    %44 = vector.broadcast %c-2147483648_i32 : i32 to vector<16x64xi32>
    %45 = arith.select %43, %44, %39 : vector<16x64xi1>, vector<16x64xi32>
    %c1_i32 = arith.constant 1 : i32
    %cst_15 = arith.constant dense<-2147483648> : vector<16xi32>
    %46 = vector.multi_reduction <maxsi>, %45, %cst_15 [1] : vector<16x64xi32> to vector<16xi32>
    %47 = vector.shape_cast %46 : vector<16xi32> to vector<16x1xi32>
    %48 = vector.broadcast %47 : vector<16x1xi32> to vector<16x64xi32>
    %49 = arith.cmpi eq, %45, %48 : vector<16x64xi32>
    %c-2147483648_i32_16 = arith.constant -2147483648 : i32
    %50 = vector.broadcast %c-2147483648_i32_16 : i32 to vector<16x64xi32>
    %51 = arith.select %49, %50, %45 : vector<16x64xi1>, vector<16x64xi32>
    %c2_i32 = arith.constant 2 : i32
    %cst_17 = arith.constant dense<-2147483648> : vector<16xi32>
    %52 = vector.multi_reduction <maxsi>, %51, %cst_17 [1] : vector<16x64xi32> to vector<16xi32>
    %53 = vector.shape_cast %52 : vector<16xi32> to vector<16x1xi32>
    %54 = vector.broadcast %53 : vector<16x1xi32> to vector<16x64xi32>
    %55 = arith.cmpi eq, %51, %54 : vector<16x64xi32>
    %c-2147483648_i32_18 = arith.constant -2147483648 : i32
    %56 = vector.broadcast %c-2147483648_i32_18 : i32 to vector<16x64xi32>
    %57 = arith.select %55, %56, %51 : vector<16x64xi1>, vector<16x64xi32>
    %c3_i32 = arith.constant 3 : i32
    %cst_19 = arith.constant dense<-2147483648> : vector<16xi32>
    %58 = vector.multi_reduction <maxsi>, %57, %cst_19 [1] : vector<16x64xi32> to vector<16xi32>
    %59 = vector.shape_cast %58 : vector<16xi32> to vector<16x1xi32>
    %60 = vector.broadcast %59 : vector<16x1xi32> to vector<16x64xi32>
    %61 = arith.cmpi eq, %57, %60 : vector<16x64xi32>
    %c-2147483648_i32_20 = arith.constant -2147483648 : i32
    %62 = vector.broadcast %c-2147483648_i32_20 : i32 to vector<16x64xi32>
    %63 = arith.select %61, %62, %57 : vector<16x64xi1>, vector<16x64xi32>
    %c4_i32 = arith.constant 4 : i32
    %cst_21 = arith.constant dense<-2147483648> : vector<16xi32>
    %64 = vector.multi_reduction <maxsi>, %63, %cst_21 [1] : vector<16x64xi32> to vector<16xi32>
    %65 = vector.shape_cast %64 : vector<16xi32> to vector<16x1xi32>
    %66 = vector.broadcast %65 : vector<16x1xi32> to vector<16x64xi32>
    %67 = arith.cmpi eq, %63, %66 : vector<16x64xi32>
    %c-2147483648_i32_22 = arith.constant -2147483648 : i32
    %68 = vector.broadcast %c-2147483648_i32_22 : i32 to vector<16x64xi32>
    %69 = arith.select %67, %68, %63 : vector<16x64xi1>, vector<16x64xi32>
    %c5_i32 = arith.constant 5 : i32
    %cst_23 = arith.constant dense<-2147483648> : vector<16xi32>
    %70 = vector.multi_reduction <maxsi>, %69, %cst_23 [1] : vector<16x64xi32> to vector<16xi32>
    %71 = vector.shape_cast %70 : vector<16xi32> to vector<16x1xi32>
    %72 = vector.broadcast %71 : vector<16x1xi32> to vector<16x64xi32>
    %73 = arith.cmpi eq, %69, %72 : vector<16x64xi32>
    %c-2147483648_i32_24 = arith.constant -2147483648 : i32
    %74 = vector.broadcast %c-2147483648_i32_24 : i32 to vector<16x64xi32>
    %75 = arith.select %73, %74, %69 : vector<16x64xi1>, vector<16x64xi32>
    %c-2147483648_i32_25 = arith.constant -2147483648 : i32
    %76 = vector.broadcast %c-2147483648_i32_25 : i32 to vector<16x64xi32>
    %77 = arith.cmpi eq, %75, %76 : vector<16x64xi32>
    %cst_26 = arith.constant 0.000000e+00 : f32
    %78 = vector.broadcast %cst_26 : f32 to vector<16x64xf32>
    %79 = arith.select %77, %25, %78 : vector<16x64xi1>, vector<16x64xf32>
    %cst_27 = arith.constant dense<0.000000e+00> : vector<16xf32>
    %80 = vector.multi_reduction <add>, %79, %cst_27 [1] : vector<16x64xf32> to vector<16xf32>
    %81 = vector.shape_cast %80 : vector<16xf32> to vector<16x1xf32>
    %cst_28 = arith.constant 0.166666672 : f32
    %82 = vector.broadcast %cst_28 : f32 to vector<16x1xf32>
    %83 = arith.mulf %81, %82 : vector<16x1xf32>
    %84 = arith.truncf %26 : vector<16x32xf32> to vector<16x32xbf16>
    %c0_29 = arith.constant 0 : index
    %c0_30 = arith.constant 0 : index
    %85 = vector.load %arg3[%c0_29, %c0_30] : memref<32x32xbf16, #tpu.memory_space<vmem>>, vector<32x32xbf16>
    %cst_31 = arith.constant dense<0.000000e+00> : vector<16x32xf32>
    %86 = tpu.matmul %84, %85, %cst_31 {dimension_numbers = #tpu.dot_dimension_numbers<[1], [0], [0], [1], [0, 0, 1, 1], [], []>} : vector<16x32xbf16>, vector<32x32xbf16>, vector<16x32xf32> -> vector<16x32xf32>
    %c0_32 = arith.constant 0 : index
    %c0_33 = arith.constant 0 : index
    %87 = vector.load %arg4[%c0_32, %c0_33] : memref<1x32xf32, #tpu.memory_space<vmem>>, vector<1x32xf32>
    %88 = vector.broadcast %27 : vector<16x1xf32> to vector<16x32xf32>
    %89 = vector.broadcast %87 : vector<1x32xf32> to vector<16x32xf32>
    %90 = arith.mulf %88, %89 : vector<16x32xf32>
    %91 = arith.addf %86, %90 : vector<16x32xf32>
    %c0_34 = arith.constant 0 : index
    %c0_35 = arith.constant 0 : index
    %92 = vector.load %arg5[%c0_34, %c0_35] : memref<1x32xf32, #tpu.memory_space<vmem>>, vector<1x32xf32>
    %93 = vector.broadcast %92 : vector<1x32xf32> to vector<16x32xf32>
    %94 = arith.mulf %91, %93 : vector<16x32xf32>
    %c0_36 = arith.constant 0 : index
    %c0_37 = arith.constant 0 : index
    %95 = vector.load %arg6[%c0_36, %c0_37] : memref<1x32xf32, #tpu.memory_space<vmem>>, vector<1x32xf32>
    %96 = vector.broadcast %95 : vector<1x32xf32> to vector<16x32xf32>
    %97 = arith.addf %94, %96 : vector<16x32xf32>
    %c0_38 = arith.constant 0 : index
    %c0_39 = arith.constant 0 : index
    %98 = vector.load %arg7[%c0_38, %c0_39] : memref<16x32xf32, #tpu.memory_space<vmem>>, vector<16x32xf32>
    %99 = arith.mulf %98, %97 : vector<16x32xf32>
    %cst_40 = arith.constant dense<0.000000e+00> : vector<16xf32>
    %100 = vector.multi_reduction <add>, %99, %cst_40 [1] : vector<16x32xf32> to vector<16xf32>
    %101 = vector.shape_cast %100 : vector<16xf32> to vector<16x1xf32>
    %102 = arith.addf %83, %101 : vector<16x1xf32>
    %103 = tpu.iota {dimensions = array<i32: 0>} : vector<16x16xi32>
    %104 = tpu.iota {dimensions = array<i32: 1>} : vector<16x16xi32>
    %105 = arith.cmpi eq, %103, %104 : vector<16x16xi32>
    %cst_41 = arith.constant 0.000000e+00 : f32
    %106 = vector.shape_cast %102 : vector<16x1xf32> to vector<16x1xf32>
    %107 = vector.broadcast %106 : vector<16x1xf32> to vector<16x16xf32>
    %108 = vector.broadcast %cst_41 : f32 to vector<16x16xf32>
    %109 = arith.select %105, %107, %108 : vector<16x16xi1>, vector<16x16xf32>
    %cst_42 = arith.constant dense<0.000000e+00> : vector<16xf32>
    %110 = vector.multi_reduction <add>, %109, %cst_42 [0] : vector<16x16xf32> to vector<16xf32>
    %111 = vector.shape_cast %110 : vector<16xf32> to vector<1x16xf32>
    %c0_43 = arith.constant 0 : index
    %c0_44 = arith.constant 0 : index
    %112 = vector.load %arg8[%c0_43, %c0_44] : memref<1x16xf32, #tpu.memory_space<vmem>>, vector<1x16xf32>
    %113 = arith.addf %111, %112 : vector<1x16xf32>
    %cst_45 = arith.constant 5.000000e-01 : f32
    %114 = vector.broadcast %cst_45 : f32 to vector<1x16xf32>
    %115 = arith.mulf %113, %114 : vector<1x16xf32>
    %116 = vector.shape_cast %115 : vector<1x16xf32> to vector<1x1x16xf32>
    %c0_46 = arith.constant 0 : index
    %c0_47 = arith.constant 0 : index
    %c0_48 = arith.constant 0 : index
    %117 = vector.load %arg9[%c0_46, %c0_47, %c0_48] : memref<1x1x16xf32, #tpu.memory_space<vmem>>, vector<1x1x16xf32>
    tpu.vector_store %arg9[%c0_46, %c0_47, %c0_48], %116 {strides = array<i32>} : memref<1x1x16xf32, #tpu.memory_space<vmem>>, vector<1x1x16xf32>,
    return
  }
  func.func @transform_0(%arg0: i32) -> (i32, i32, i32) {
    %c0_i32 = arith.constant 0 : i32
    %c0_i32_0 = arith.constant 0 : i32
    %c0_i32_1 = arith.constant 0 : i32
    return %arg0, %c0_i32, %c0_i32_0 : i32, i32, i32
  }
  func.func @transform_1(%arg0: i32) -> (i32, i32) {
    %c0_i32 = arith.constant 0 : i32
    %c0_i32_0 = arith.constant 0 : i32
    %c0_i32_1 = arith.constant 0 : i32
    return %c0_i32, %c0_i32_0 : i32, i32
  }
  func.func @transform_2(%arg0: i32) -> (i32, i32) {
    %c0_i32 = arith.constant 0 : i32
    %c0_i32_0 = arith.constant 0 : i32
    %c0_i32_1 = arith.constant 0 : i32
    return %c0_i32, %c0_i32_0 : i32, i32
  }
  func.func @transform_3(%arg0: i32) -> (i32, i32) {
    %c0_i32 = arith.constant 0 : i32
    %c0_i32_0 = arith.constant 0 : i32
    %c0_i32_1 = arith.constant 0 : i32
    return %c0_i32, %c0_i32_0 : i32, i32
  }
  func.func @transform_4(%arg0: i32) -> (i32, i32) {
    %c0_i32 = arith.constant 0 : i32
    %c0_i32_0 = arith.constant 0 : i32
    %c0_i32_1 = arith.constant 0 : i32
    return %c0_i32, %c0_i32_0 : i32, i32
  }
  func.func @transform_5(%arg0: i32) -> (i32, i32) {
    %c0_i32 = arith.constant 0 : i32
    %c0_i32_0 = arith.constant 0 : i32
    %c0_i32_1 = arith.constant 0 : i32
    return %c0_i32, %c0_i32_0 : i32, i32
  }
  func.func @transform_6(%arg0: i32) -> (i32, i32) {
    %c0_i32 = arith.constant 0 : i32
    %c0_i32_0 = arith.constant 0 : i32
    %c0_i32_1 = arith.constant 0 : i32
    return %c0_i32, %c0_i32_0 : i32, i32
  }
  func.func @transform_7(%arg0: i32) -> (i32, i32) {
    %c0_i32 = arith.constant 0 : i32
    %c0_i32_0 = arith.constant 0 : i32
    %c0_i32_1 = arith.constant 0 : i32
    return %c0_i32, %c0_i32_0 : i32, i32
  }
  func.func @transform_8(%arg0: i32) -> (i32, i32, i32) {
    %c0_i32 = arith.constant 0 : i32
    %c0_i32_0 = arith.constant 0 : i32
    %c0_i32_1 = arith.constant 0 : i32
    return %arg0, %c0_i32, %c0_i32_0 : i32, i32, i32
  }
}

</mosaic_0001>

<bundles_post_ra>
// kernel: tpu_custom_call.1
= control target key start
LH: loop header
LB: loop body
LE: loop exit
PB: predicated region body
PF: predicated region fallthrough
CT: control target
= control target key end

     0   :  { %s1802_s0 = inlined_call_operand.hbm [shape: bf16[4,32,64], index: 0, kind: input, shape index: {}]   ;;  %s1803_s1 = inlined_call_operand.hbm [shape: bf16[8,32], index: 1, kind: input, shape index: {}]   ;;  %s1804_s2 = inlined_call_operand.hbm [shape: bf16[32,32], index: 2, kind: input, shape index: {}]   ;;  %s1805_s3 = inlined_call_operand.vmem [shape: f32[1,32], index: 3, kind: input, shape index: {}]   ;;  %s1806_s4 = inlined_call_operand.vmem [shape: f32[1,32], index: 4, kind: input, shape index: {}]   ;;  %s1807_s5 = inlined_call_operand.vmem [shape: f32[1,32], index: 5, kind: input, shape index: {}]   ;;  %s1808_s6 = inlined_call_operand.hbm [shape: f32[16,32], index: 6, kind: input, shape index: {}]   ;;  %s1809_s7 = inlined_call_operand.vmem [shape: f32[1,16], index: 7, kind: input, shape index: {}]   ;;  %s1810_s8 = inlined_call_operand.hbm [shape: f32[2,1,16], index: 8, kind: output, shape index: {}]  }
   0x1   :  { %1817 = sst [smem:[#allocation15_spill]] %s1803_s1 }
   0x2   :  { %1818 = sst [smem:[#allocation16_spill]] %s1804_s2 }
   0x3   :  { %13 = vsyncpa [#allocation3], 0 }
   0x4   :  { %15 = vsyncpa [#allocation3 + $0x1], 0 }
   0x5   :  { %16 = vsyncpa [#allocation6], 0 }
   0x6   :  { %17 = vsyncpa [#allocation9], 0 }
   0x7   :  { %18 = vsyncpa [#allocation4], 0 }
   0x8   :  { %20 = vsyncpa [#allocation4 + $0x1], 0  ;;  %s1508_s27 = smov 0   ;;  %s1510_s28 = smov 0  }
   0x9   :  { %s1512_s29 = smov 0   ;;  %s1514_s30 = smov 0  }
   0xa LB: > { %s1529_s9 = sadd.s32 4294967295, %s1449_s30   ;;  %s1076_s10 = sadd.s32 4294967294, %s1449_s30   ;;  %s1449_s30 = sphi %s1514_s30, %s1842_s30   ;;  %s1445_s29 = sphi %s1512_s29, %s1841_s29   ;;  %s1441_s28 = sphi %s1510_s28, %s1840_s28   ;;  %s1437_s27 = sphi %s1508_s27, %s1839_s27  }
   0xb   : > { %p46_p0 = scmp.ne.s32.totalorder %s1441_s28, %s1437_s27  ;;  %p1811_p1 = scmp.eq.s32.totalorder %s1529_s9, 0 }
   0xc   : > { %p223_p3 = scmp.eq.s32.totalorder %s1076_s10, 1  ;;  %p1077_p5 = scmp.ge.s32.totalorder %s1449_s30, 1 }
   0xd   : > { %p1538_p4 = por %p1811_p1, %p46_p0  ;;  %p230_p7 = scmp.lt.s32.totalorder %s1449_s30, 3 }
   0xe   : > { %p1543_p6 = por %p223_p3, %p46_p0  ;;  %s1451_s14 = smov [#allocation5]  }
   0xf   : > { %s1819_s11 = scalar_select %p1538_p4, 1, 0 }
  0x10   : > { %s1820_s12 = scalar_select %p1543_p6, 1, 0 }
  0x11   : > { %p1548_p8 = pnand %p1077_p5, %p230_p7  ;;  %s243_s15 = sshll.u32 %s1451_s14, 4  ;;  %s244_s15 = int_to_ptr.vmem [resolvable:$true] %s243_s15 }
  0x12   : > { %s1452_s16 = smov [#allocation7]   ;;  %s1453_s19 = smov [#allocation8]  }
  0x13   : > { %s1821_s13 = scalar_select %p1548_p8, 1, 0 }
  0x14   : > { %p1187_p10 = pneg %p1548_p8  ;;  %s253_s17 = sshll.u32 %s1452_s16, 4  ;;  %s254_s17 = int_to_ptr.vmem [resolvable:$true] %s253_s17 }
  0x15   : > { %s275_s20 = sshll.u32 %s1453_s19, 4  ;;  %s1282_s21 = scalar_lea.vmem %s244_s15, 64  ;;  %s276_s20 = int_to_ptr.vmem [resolvable:$true] %s275_s20 }
  0x16   : > { %p1557_p11 = pnand %p1187_p10, %p1811_p1  ;;  %p1283_p13 = scmp.ne.s32.totalorder %s244_s15, %s1282_s21 }
  0x17   : > { %p1290_p5 = scmp.lt.s32.totalorder %s244_s15, %s244_s15  ;;  %p1291_p7 = scmp.lt.s32.totalorder %s1282_s21, %s1282_s21 }
  0x18   : > { %p1273_p12 = pneg %p1557_p11 }
  0x19   : > { %p1292_p9 = por %p1291_p7, %p1290_p5 }
  0x1a   : > { %p1285_p0 = pnand %p1283_p13, %p1273_p12 }
  0x1c   : > { %p1286_p3 = pneg %p1285_p0 }
  0x1e   : > { %p1293_p10 = pnand %p1292_p9, %p1286_p3 }
  0x20   : > { %1296 = shalt.err (!%p1293_p10)
}
  0x21   : > { %s1823_s1 = sld [smem:[#allocation15_spill]]  ;;  %s1308_s24 = scalar_lea.vmem %s254_s17, 256 }
  0x22   : > { %p1309_p1 = scmp.ne.s32.totalorder %s254_s17, %s1308_s24  ;;  %p1316_p13 = scmp.lt.s32.totalorder %s254_s17, %s254_s17 }
  0x23   : > { %p1317_p0 = scmp.lt.s32.totalorder %s1308_s24, %s1308_s24 }
  0x24   : > { %p1311_p2 = pnand %p1309_p1, %p1273_p12 }
  0x25   : > { %p1318_p4 = por %p1317_p0, %p1316_p13 }
  0x26   : > { %p1312_p6 = pneg %p1311_p2 }
  0x27   : > { %1190 = dma.hbm_to_vmem [thread:$0]  (!%p1557_p11), %s1823_s1, 64, %s244_s15, [#allocation6]  }
  0x28   : > { %p1319_p8 = pnand %p1318_p4, %p1312_p6 }
  0x2a   : > { %1322 = shalt.err (!%p1319_p8)
}
  0x2b   : > { %s1814_s25 = smov 64   ;;  %s1815_s26 = smov 4  }
  0x2c   : > { %s1824_s2 = sld [smem:[#allocation16_spill]]  ;;  %s1334_s15 = scalar_lea.vmem %s276_s20, 256 }
  0x2d   : > { %p1335_p1 = scmp.ne.s32.totalorder %s276_s20, %s1334_s15  ;;  %p1342_p6 = scmp.lt.s32.totalorder %s276_s20, %s276_s20 }
  0x2e   : > { %p1343_p8 = scmp.lt.s32.totalorder %s1334_s15, %s1334_s15 }
  0x2f   : > { %p1337_p2 = pnand %p1335_p1, %p1273_p12 }
  0x30   : > { %p1344_p9 = por %p1343_p8, %p1342_p6 }
  0x31   : > { %p1338_p4 = pneg %p1337_p2 }
  0x32   : > { %1193 = dma.hbm_to_vmem [thread:$0]  (!%p1557_p11), %s1824_s2, 256, %s254_s17, [#allocation6], %s1814_s25, %s1814_s25, %s1815_s26  }
  0x33   : > { %p1345_p3 = pnand %p1344_p9, %p1338_p4 }
  0x35   : > { %1348 = shalt.err (!%p1345_p3)
}
  0x36   : > { %s1456_s16 = smov 128   ;;  %s1457_s17 = smov 8  }
  0x37   : > { %1196 = dma.hbm_to_vmem [thread:$0]  (!%p1557_p11), %s1808_s6, 256, %s276_s20, [#allocation9], %s1456_s16, %s1456_s16, %s1457_s17  }
  0x38   : > { %s1591_s22 = sadd.s32 1, %s1449_s30   ;;  %s33_s24 = sadd.s32 1, %s1445_s29 }
  0x39   : > { %s30_s23 = ssub.s32 %s1449_s30, %s1591_s22  ;;  %p40_p5 = scmp.ne.s32.totalorder %s1445_s29, %s1441_s28 }
  0x3a   : > { %p31_p12 = scmp.eq.s32.totalorder %s30_s23, 0  ;;  %p41_p7 = scmp.eq.s32.totalorder %s1449_s30, 0 }
  0x3b   : > { %p1208_p10 = scmp.lt.s32.totalorder %s1449_s30, 2  ;;  %p1825_p0 = scmp.eq.s32.totalorder %s1529_s9, 1 }
  0x3c   : > { %s1601_s10 = scalar_select %p31_p12, %s1445_s29, %s33_s24  }
  0x3d   : > { %p42_p13 = por %p41_p7, %p40_p5  ;;  %p1605_p1 = por %p1825_p0, %p40_p5 }
  0x3e   : > { %s292_s18 = sand.u32 1, %s1445_s29   ;;  %s1115_s15 = sshll.u32 %s1449_s30, 9 }
  0x3f   : > { %s1826_s14 = scalar_select %p1605_p1, 1, 0 }
  0x40   : > { %s1082_s20 = sshll.u32 %s292_s18, 5  ;;  %s1614_s19 = scalar_lea.hbm %s1802_s0, %s1115_s15 }
  0x41   : > { %s296_s21 = scalar_lea.vmem [#allocation2], %s1082_s20  ;;  %p1616_p11 = pnand %p1208_p10, %p42_p13 }
  0x42   : > { %s304_s23 = sshll.u32 %s296_s21, 4  ;;  %s1622_s25 = scalar_lea.sflag [#allocation3], %s292_s18  ;;  %s1620_s23 = int_to_ptr.vmem [resolvable:$true] %s304_s23 }
  0x43   : > { %s1349_s26 = scalar_lea.hbm %s1614_s19, 512  ;;  %p1351_p4 = pneg %p1616_p11 }
  0x44   : > { %p1350_p2 = scmp.ne.s32.totalorder %s1614_s19, %s1349_s26  ;;  %s1354_s20 = scalar_lea.hbm %s1802_s0, 1024 }
  0x45   : > { %p1355_p9 = scmp.lt.s32.totalorder %s1614_s19, %s1802_s0  ;;  %p1356_p3 = scmp.lt.s32.totalorder %s1354_s20, %s1349_s26 }
  0x46   : > { %p1352_p6 = pnand %p1351_p4, %p1350_p2 }
  0x47   : > { %p1357_p12 = por %p1356_p3, %p1355_p9 }
  0x48   : > { %p1353_p8 = pneg %p1352_p6 }
  0x4a   : > { %p1358_p5 = pnand %p1357_p12, %p1353_p8 }
  0x4c   : > { %1361 = shalt.err (!%p1358_p5)
}
  0x4d   : > { %s1362_s18 = scalar_lea.vmem %s1620_s23, 512  ;;  %s1458_s1 = smov [#allocation2]  }
  0x4e   : > { %p1363_p7 = scmp.ne.s32.totalorder %s1620_s23, %s1362_s18  ;;  %s1367_s2 = sshll.u32 %s1458_s1, 4  ;;  %s1368_s2 = int_to_ptr.vmem [resolvable:$false] %s1367_s2 }
  0x4f   : > { %s1369_s15 = scalar_lea.vmem %s1368_s2, 1024  ;;  %p1370_p0 = scmp.lt.s32.totalorder %s1620_s23, %s1368_s2 }
  0x50   : > { %p1365_p10 = pnand %p1363_p7, %p1351_p4  ;;  %p1371_p2 = scmp.lt.s32.totalorder %s1369_s15, %s1362_s18 }
  0x52   : > { %p1366_p13 = pneg %p1365_p10  ;;  %p1372_p6 = por %p1371_p2, %p1370_p0 }
  0x54   : > { %p1373_p1 = pnand %p1372_p6, %p1366_p13 }
  0x56   : > { %1376 = shalt.err (!%p1373_p1)
}
  0x57   : > { %s1828_s26 = smov 4   ;;  %s1829_s16 = smov 64  }
  0x58   : > { %1200 = dma.hbm_to_vmem [thread:$0]  (!%p1616_p11), %s1614_s19, 512, %s1620_s23, %s1622_s25, %s1829_s16, %s1829_s16, %s1828_s26  }
  0x59   : > { %p1830_p4 = scmp.ne.s32.totalorder %s1821_s13, 0 }
  0x5a   : > { %s1649_s1 = sand.u32 (!%p1830_p4), 1, %s1441_s28   ;;  %p1831_p1 = scmp.ne.s32.totalorder (!%p1830_p4), %s1819_s11, 0 }
  0x5b   : > { %316 = sbr.rel (%p1830_p4) target bundleno = 2237 (0x8bd), region = 52  ;;  %s1087_s2 = sshll.u32 (!%p1830_p4), %s1649_s1, 5 }
  0x5c   : > { %s319_s20 = scalar_lea.sflag (!%p1830_p4), [#allocation3], %s1649_s1  ;;  %s322_s17 = scalar_lea.vmem (!%p1830_p4), [#allocation2], %s1087_s2 }
  0x60   : > { %1420 = dma.done.wait (%p1831_p1), %s319_s20, 512  }
  0x61   : > { %1422 = vsyncadd (%p1831_p1), %s319_s20, 4294966784  ;;  %p1832_p8 = scmp.eq.s32.totalorder %s1529_s9, 0 }
  0x63   : > { %1424 = dma.done.wait (%p1832_p8), [#allocation6], 320   ;;  %p1833_p11 = pmov %p1832_p8 }
  0x64   : > { %p1834_p9 = pmov %p1832_p8 }
  0x65   : > { %1426 = vsyncadd (%p1833_p11), [#allocation6], 4294966976 }
  0x66   : > { %1428 = dma.done.wait (%p1834_p9), [#allocation9], 256   ;;  %p1835_p3 = pmov %p1832_p8 }
  0x67   : > { %v1459_v0 = vmov 0.0   ;;  %vm1460_vm0 = vmmov 0   ;;  %v1257_v1 = vld [vmem:[%s322_s17 + $0x8] sm:$0xff]   ;;  %v1258_v2 = vld [vmem:[%s322_s17] sm:$0xff]   ;;  %vm385_vm1 = vcmask 261120   ;;  %v1259_v4 = vld [vmem:[%s322_s17 + $0x18] sm:$0xff]   ;;  %v613_v10 = vlaneseq }
  0x68   : > { %1430 = vsyncadd (%p1835_p3), [#allocation9], 4294967040  ;;  %1131 = vmatprep.subr.bf16.mxu0 %v1459_v0  ;;  %1135 = vmatprep.mubr.msk.bf16.mxu0 %vm1460_vm0, %v1459_v0  ;;  %v368_v3 = vld [vmem:[#allocation5] sm:$0xf]  ;;  %v1260_v5 = vld [vmem:[%s322_s17 + $0x10] sm:$0xff]   ;;  %vm435_vm2 = vcmask 523264  }
  0x69   : > { %1139 = vmatprep.subr.bf16.mxu1 %v1459_v0  ;;  %1143 = vmatprep.mubr.msk.bf16.mxu1 %vm1460_vm0, %v1459_v0  ;;  %v447_v6 = vsel %vm435_vm2, %v1257_v1, 0  ;;  %v444_v7 = vsel %vm435_vm2, %v1258_v2, 0  ;;  %v563_v8 = vsel %vm435_vm2, %v1259_v4, 0  ;;  %v560_v9 = vsel %vm435_vm2, %v1260_v5, 0  ;;  %v1261_v45 = vld [vmem:[#allocation7 + $0x8] sm:$0xff]   ;;  %v1262_v46 = vld [vmem:[#allocation7] sm:$0xff]  }
  0x6a   : > { %1132 = vmatpush3.bf16.msra.mxu0 %v1257_v1  ;;  %1140 = vmatpush3.bf16.xpose.msra.mxu1 %v447_v6  ;;  %v1689_v11 = vand.u32 127, %v613_v10  ;;  %s1111_s15 = sshll.u32 %s1529_s9, 4  ;;  %s365_s26 = scalar_lea.vmem [#allocation10], %s1649_s1 }
  0x6b   : > { %1133 = vmatprep.subr.bf16.mxu0 %v1459_v0  ;;  %1141 = vmatprep.subr.bf16.mxu1 %v1459_v0  ;;  %s981_s16 = sshll.u32 %s365_s26, 4  ;;  %s979_s17 = scalar_lea.hbm %s1810_s8, %s1111_s15  ;;  %s982_s16 = int_to_ptr.vmem [resolvable:$true] %s981_s16 }
  0x6c   : > { %v617_v16 = vsub.s32 63, %v1689_v11  ;;  %s969_s11 = scalar_lea.sflag [#allocation4], %s1649_s1  ;;  %s1377_s13 = scalar_lea.vmem %s982_s16, 16 }
  0x6d   : > { %p1378_p12 = scmp.ne.s32.totalorder %s982_s16, %s1377_s13  ;;  %p1836_p5 = scmp.ne.s32.totalorder %s1826_s14, 0 }
  0x6e   : > { %1134 = vmatpush3.bf16.msra.mxu0 %v1258_v2  ;;  %s1462_s25 = smov [#allocation10]  }
  0x6f   : > { %1147 = vmatprep.subr.bf16.mxu0 %v1459_v0  ;;  %p1379_p7 = pnand %p1378_p12, %p1836_p5  ;;  %s1381_s19 = sshll.u32 %s1462_s25, 4  ;;  %s1382_s19 = int_to_ptr.vmem [resolvable:$false] %s1381_s19 }
  0x70   : > { %s1383_s9 = scalar_lea.vmem %s1382_s19, 32  ;;  %p1384_p13 = scmp.lt.s32.totalorder %s982_s16, %s1382_s19 }
  0x71   : > { %1136 = vmatmul.mubr.msk.bf16.vlgmr.msra.gmra.mxu0 %vm385_vm1, %v368_v3  ;;  %p1380_p10 = pneg %p1379_p7  ;;  %p1385_p0 = scmp.lt.s32.totalorder %s1383_s9, %s1377_s13 }
  0x72   : > { %1148 = vmatpush3.bf16.msra.mxu0 %v1259_v4  ;;  %1151 = vmatprep.mubr.msk.bf16.mxu0 %vm1460_vm0, %v1459_v0 }
  0x73   : > { %1149 = vmatprep.subr.bf16.mxu0 %v1459_v0  ;;  %1142 = vmatpush3.bf16.xpose.msra.mxu1 %v444_v7  ;;  %p1386_p2 = por %p1385_p0, %p1384_p13 }
  0x74   : > { %1163 = vmatprep.subr.bf16.mxu1 %v1459_v0 }
  0x75   : > { %p1387_p6 = pnand %p1386_p2, %p1380_p10 }
  0x76   : > { %1150 = vmatpush3.bf16.msra.mxu0 %v1260_v5 }
  0x77   : > { %1155 = vmatprep.subr.bf16.mxu0 %v1459_v0 }
  0x79   : > { %1152 = vmatmul.mubr.msk.bf16.vlgmr.msra.gmra.mxu0 %vm385_vm1, %v368_v3 }
  0x7a   : > { %1159 = vmatprep.mubr.msk.bf16.mxu0 %vm1460_vm0, %v1459_v0  ;;  %1156 = vmatpush3.bf16.xpose.msra.mxu0 %v563_v8 }
  0x7b   : > { %1157 = vmatprep.subr.bf16.mxu0 %v1459_v0 }
  0x82   : > { %1158 = vmatpush3.bf16.xpose.msra.mxu0 %v560_v9 }
 0x131   : > { %v1691_v12 = vpop.f32.mrf.mxu0 }
 0x132   : > { %v1094_v13 = vmul.f32 -1.442695, %v1691_v12  ;;  %vm607_vm3 = vcmp.lt.s32.totalorder %v1691_v12, 0  ;;  %v609_v14 = vxor.u32 2147483647, %v1691_v12 }
 0x133   : > { %v1137_v15 = vpop.f32.mrf.mxu0 }
 0x134   : > { %1263 = vpow2.f32 %v1094_v13  ;;  %v611_v17 = vsel %vm607_vm3, %v609_v14, %v1691_v12 }
 0x135   : > { %v615_v18 = vand.u32 4294967232, %v611_v17  ;;  %v426_v19 = vpop.f32.mrf.mxu0 }
 0x137   : > { %v1138_v20 = vpop.f32.mrf.mxu0  ;;  %v1698_v21 = vor.u32 %v617_v16, %v615_v18 }
 0x139   : > { %v1700_v22 = vpop.f32.mrf.mxu0  ;;  %v620_v23 = vsel %vm435_vm2, %v1698_v21, 2147483648 }
 0x13a   : > { %v1103_v24 = vmul.f32 -1.442695, %v1700_v22  ;;  %vm608_vm4 = vcmp.lt.s32.totalorder %v1700_v22, 0  ;;  %v610_v25 = vxor.u32 2147483647, %v1700_v22  ;;  %v622_v26 = vshra.s32 %v620_v23, 16 }
 0x13b   : > { %v1153_v27 = vpop.f32.mrf.mxu0  ;;  %v621_v47 = vand.u32 65535, %v620_v23 }
 0x13c   : > { %1265 = vpow2.f32 %v1103_v24  ;;  %v612_v28 = vsel %vm608_vm4, %v610_v25, %v1700_v22  ;;  %v624_v29 = vcvt.s32.f32 %v622_v26 }
 0x13d   : > { %v616_v30 = vand.u32 4294967232, %v612_v28  ;;  %v543_v31 = vpop.f32.mrf.mxu0  ;;  %v623_v49 = vcvt.s32.f32 %v621_v47 }
 0x13e   : > { %625 = vmax.xlane.f32.xlu0 %v624_v29 }
 0x13f   : > { %v1154_v32 = vpop.f32.mrf.mxu0  ;;  %v619_v33 = vor.u32 %v617_v16, %v616_v30 }
 0x141   : > { %v1264_v34 = vpop.eup %1263  ;;  %v635_v35 = vsel %vm435_vm2, %v619_v33, 2147483648 }
 0x142   : > { %v432_v36 = vadd.f32 1.0, %v1264_v34  ;;  %v637_v37 = vshra.s32 %v635_v35, 16  ;;  %v636_v51 = vand.u32 65535, %v635_v35 }
 0x144   : > { %1267 = vrcp.f32 %v432_v36  ;;  %v639_v38 = vcvt.s32.f32 %v637_v37  ;;  %v638_v53 = vcvt.s32.f32 %v636_v51 }
 0x146   : > { %640 = vmax.xlane.f32.xlu0 %v639_v38 }
 0x149   : > { %v1266_v39 = vpop.eup %1265 }
 0x14a   : > { %v549_v40 = vadd.f32 1.0, %v1266_v39 }
 0x14c   : > { %1269 = vrcp.f32 %v549_v40 }
 0x151   : > { %v1709_v41 = vpop.eup %1267 }
 0x152   : > { %v439_v42 = vpack.c.bf16 %v1709_v41, %v1709_v41 }
 0x154   : > { %1144 = vmatmul.mubr.msk.bf16.vlgmr.msra.gmra.mxu1 %vm435_vm2, %v439_v42 }
 0x155   : > { %1167 = vmatprep.mubr.msk.bf16.mxu1 %vm1460_vm0, %v1459_v0  ;;  %1164 = vmatpush3.bf16.msra.mxu1 %v1261_v45 }
 0x156   : > { %1165 = vmatprep.subr.bf16.mxu1 %v1459_v0 }
 0x159   : > { %v1716_v43 = vpop.eup %1269  ;;  %1166 = vmatpush3.bf16.msra.mxu1 %v1262_v46 }
 0x15a   : > { %v555_v44 = vpack.c.bf16 %v1716_v43, %v1716_v43 }
 0x15c   : > { %1160 = vmatmul.mubr.msk.bf16.vlgmr.msra.gmra.mxu0 %vm435_vm2, %v555_v44 }
 0x1c7   : > { %v626_v48 = vpop.xlane.xlu0 %625 }
 0x1c8   : > { %vm627_vm5 = vcmp.eq.f32.partialorder %v624_v29, %v626_v48  ;;  %v632_v0 = vcvt.f32.s32 %v626_v48 }
 0x1c9   : > { %v628_v50 = vsel %vm627_vm5, %v623_v49, -inf }
 0x1ca   : > { %629 = vmax.xlane.f32.xlu1 %v628_v50  ;;  %v633_v2 = vshll.u32 %v632_v0, 16 }
 0x1cf   : > { %v641_v52 = vpop.xlane.xlu0 %640 }
 0x1d0   : > { %vm642_vm6 = vcmp.eq.f32.partialorder %v639_v38, %v641_v52  ;;  %v647_v5 = vcvt.f32.s32 %v641_v52 }
 0x1d1   : > { %v643_v54 = vsel %vm642_vm6, %v638_v53, -inf }
 0x1d2   : > { %644 = vmax.xlane.f32.xlu1 %v643_v54  ;;  %v648_v13 = vshll.u32 %v647_v5, 16 }
 0x214   : > { %v483_v55 = vpop.f32.mrf.mxu1 }
 0x216   : > { %v1145_v56 = vpop.f32.mrf.mxu1 }
 0x218   : > { %v486_v57 = vpop.f32.mrf.mxu1 }
 0x21a   : > { %v1146_v58 = vpop.f32.mrf.mxu1 }
 0x21c   : > { %v599_v59 = vpop.f32.mrf.mxu0 }
 0x21d   : > { %v836_v60 = vpack.c.bf16 %v599_v59, %v483_v55 }
 0x21e   : > { %v1161_v61 = vpop.f32.mrf.mxu0 }
 0x21f   : > { %1168 = vmatmul.mubr.msk.bf16.vlgmr.msra.gmra.mxu1 %vm385_vm1, %v836_v60 }
 0x220   : > { %v602_v62 = vpop.f32.mrf.mxu0 }
 0x222   : > { %v1162_v63 = vpop.f32.mrf.mxu0 }
 0x253   : > { %v630_v1 = vpop.xlane.xlu1 %629 }
 0x254   : > { %v631_v3 = vcvt.f32.s32 %v630_v1 }
 0x256   : > { %v634_v4 = vadd.s32 %v633_v2, %v631_v3 }
 0x258   : > { %vm650_vm7 = vcmp.eq.s32.totalorder %v1698_v21, %v634_v4 }
 0x259   : > { %v652_v6 = vsel %vm650_vm7, 2147483648, %v1698_v21 }
 0x25a   : > { %v654_v7 = vsel %vm435_vm2, %v652_v6, 2147483648 }
 0x25b   : > { %v645_v8 = vpop.xlane.xlu1 %644  ;;  %v656_v9 = vshra.s32 %v654_v7, 16  ;;  %v655_v25 = vand.u32 65535, %v654_v7 }
 0x25c   : > { %v646_v14 = vcvt.f32.s32 %v645_v8 }
 0x25d   : > { %v658_v15 = vcvt.s32.f32 %v656_v9  ;;  %v657_v28 = vcvt.s32.f32 %v655_v25 }
 0x25e   : > { %v649_v16 = vadd.s32 %v648_v13, %v646_v14 }
 0x25f   : > { %659 = vmax.xlane.f32.xlu0 %v658_v15 }
 0x260   : > { %vm651_vm8 = vcmp.eq.s32.totalorder %v619_v33, %v649_v16 }
 0x261   : > { %v653_v17 = vsel %vm651_vm8, 2147483648, %v619_v33 }
 0x262   : > { %v669_v18 = vsel %vm435_vm2, %v653_v17, 2147483648 }
 0x263   : > { %v671_v19 = vshra.s32 %v669_v18, 16  ;;  %v670_v30 = vand.u32 65535, %v669_v18 }
 0x265   : > { %v673_v20 = vcvt.s32.f32 %v671_v19  ;;  %v672_v32 = vcvt.s32.f32 %v670_v30 }
 0x267   : > { %674 = vmax.xlane.f32.xlu1 %v673_v20 }
 0x2df   : > { %v1727_v23 = vpop.f32.mrf.mxu1 }
 0x2e1   : > { %v1169_v24 = vpop.f32.mrf.mxu1 }
 0x2e3   : > { %v1729_v21 = vpop.f32.mrf.mxu1 }
 0x2e5   : > { %v1170_v26 = vpop.f32.mrf.mxu1 }
 0x2e8   : > { %v660_v27 = vpop.xlane.xlu0 %659 }
 0x2e9   : > { %vm661_vm9 = vcmp.eq.f32.partialorder %v658_v15, %v660_v27  ;;  %v666_v34 = vcvt.f32.s32 %v660_v27 }
 0x2ea   : > { %v662_v29 = vsel %vm661_vm9, %v657_v28, -inf }
 0x2eb   : > { %663 = vmax.xlane.f32.xlu0 %v662_v29  ;;  %v667_v36 = vshll.u32 %v666_v34, 16 }
 0x2f0   : > { %v675_v31 = vpop.xlane.xlu1 %674 }
 0x2f1   : > { %vm676_vm10 = vcmp.eq.f32.partialorder %v673_v20, %v675_v31  ;;  %v681_v39 = vcvt.f32.s32 %v675_v31 }
 0x2f2   : > { %v677_v33 = vsel %vm676_vm10, %v672_v32, -inf }
 0x2f3   : > { %678 = vmax.xlane.f32.xlu1 %v677_v33  ;;  %v682_v46 = vshll.u32 %v681_v39, 16 }
 0x374   : > { %v664_v35 = vpop.xlane.xlu0 %663 }
 0x375   : > { %v665_v37 = vcvt.f32.s32 %v664_v35 }
 0x377   : > { %v668_v38 = vadd.s32 %v667_v36, %v665_v37 }
 0x379   : > { %vm684_vm11 = vcmp.eq.s32.totalorder %v652_v6, %v668_v38 }
 0x37a   : > { %v686_v40 = vsel %vm684_vm11, 2147483648, %v652_v6 }
 0x37b   : > { %v688_v42 = vsel %vm435_vm2, %v686_v40, 2147483648 }
 0x37c   : > { %v679_v44 = vpop.xlane.xlu1 %678  ;;  %v690_v45 = vshra.s32 %v688_v42, 16  ;;  %v689_v54 = vand.u32 65535, %v688_v42 }
 0x37d   : > { %v680_v47 = vcvt.f32.s32 %v679_v44 }
 0x37e   : > { %v692_v48 = vcvt.s32.f32 %v690_v45  ;;  %v691_v56 = vcvt.s32.f32 %v689_v54 }
 0x37f   : > { %v683_v49 = vadd.s32 %v682_v46, %v680_v47 }
 0x380   : > { %693 = vmax.xlane.f32.xlu0 %v692_v48 }
 0x381   : > { %vm685_vm12 = vcmp.eq.s32.totalorder %v653_v17, %v683_v49 }
 0x382   : > { %v687_v50 = vsel %vm685_vm12, 2147483648, %v653_v17 }
 0x383   : > { %v703_v51 = vsel %vm435_vm2, %v687_v50, 2147483648 }
 0x384   : > { %v705_v52 = vshra.s32 %v703_v51, 16  ;;  %v704_v58 = vand.u32 65535, %v703_v51 }
 0x386   : > { %v707_v53 = vcvt.s32.f32 %v705_v52  ;;  %v706_v60 = vcvt.s32.f32 %v704_v58 }
 0x388   : > { %708 = vmax.xlane.f32.xlu1 %v707_v53 }
 0x409   : > { %v694_v55 = vpop.xlane.xlu0 %693 }
 0x40a   : > { %vm695_vm13 = vcmp.eq.f32.partialorder %v692_v48, %v694_v55  ;;  %v700_v62 = vcvt.f32.s32 %v694_v55 }
 0x40b   : > { %v696_v57 = vsel %vm695_vm13, %v691_v56, -inf }
 0x40c   : > { %697 = vmax.xlane.f32.xlu0 %v696_v57  ;;  %v701_v0 = vshll.u32 %v700_v62, 16 }
 0x411   : > { %v709_v59 = vpop.xlane.xlu1 %708 }
 0x412   : > { %vm710_vm14 = vcmp.eq.f32.partialorder %v707_v53, %v709_v59  ;;  %v715_v3 = vcvt.f32.s32 %v709_v59 }
 0x413   : > { %v711_v61 = vsel %vm710_vm14, %v706_v60, -inf }
 0x414   : > { %712 = vmax.xlane.f32.xlu1 %v711_v61  ;;  %v716_v8 = vshll.u32 %v715_v3, 16 }
 0x495   : > { %v698_v63 = vpop.xlane.xlu0 %697 }
 0x496   : > { %v699_v1 = vcvt.f32.s32 %v698_v63 }
 0x498   : > { %v702_v2 = vadd.s32 %v701_v0, %v699_v1 }
 0x49a   : > { %vm718_vm15 = vcmp.eq.s32.totalorder %v686_v40, %v702_v2 }
 0x49b   : > { %v720_v4 = vsel %vm718_vm15, 2147483648, %v686_v40 }
 0x49c   : > { %v722_v5 = vsel %vm435_vm2, %v720_v4, 2147483648 }
 0x49d   : > { %v713_v6 = vpop.xlane.xlu1 %712  ;;  %v724_v7 = vshra.s32 %v722_v5, 16  ;;  %v723_v19 = vand.u32 65535, %v722_v5 }
 0x49e   : > { %v714_v9 = vcvt.f32.s32 %v713_v6 }
 0x49f   : > { %v726_v13 = vcvt.s32.f32 %v724_v7  ;;  %v725_v24 = vcvt.s32.f32 %v723_v19 }
 0x4a0   : > { %v717_v14 = vadd.s32 %v716_v8, %v714_v9  ;;  %v436_v9 = vsel %vm435_vm2, %v1709_v41, 0.0 }
 0x4a1   : > { %727 = vmax.xlane.f32.xlu0 %v726_v13 }
 0x4a2   : > { %vm719_vm0 = vcmp.eq.s32.totalorder %v687_v50, %v717_v14 }
 0x4a3   : > { %v721_v15 = vsel %vm719_vm0, 2147483648, %v687_v50 }
 0x4a4   : > { %v737_v16 = vsel %vm435_vm2, %v721_v15, 2147483648 }
 0x4a5   : > { %v739_v17 = vshra.s32 %v737_v16, 16  ;;  %v738_v26 = vand.u32 65535, %v737_v16  ;;  %v552_v16 = vsel %vm435_vm2, %v1716_v43, 0.0 }
 0x4a7   : > { %v741_v18 = vcvt.s32.f32 %v739_v17  ;;  %v740_v28 = vcvt.s32.f32 %v738_v26  ;;  %v1461_v17 = vmov 0  }
 0x4a8   : > { %1255 = vset.pattern.permute.xlu0 %v1461_v17  ;;  %1256 = vset.pattern.permute.xlu1 %v1461_v17 }
 0x4a9   : > { %742 = vmax.xlane.f32.xlu1 %v741_v18 }
 0x52a   : > { %v728_v20 = vpop.xlane.xlu0 %727 }
 0x52b   : > { %vm729_vm3 = vcmp.eq.f32.partialorder %v726_v13, %v728_v20  ;;  %v734_v30 = vcvt.f32.s32 %v728_v20 }
 0x52c   : > { %v730_v25 = vsel %vm729_vm3, %v725_v24, -inf }
 0x52d   : > { %731 = vmax.xlane.f32.xlu0 %v730_v25  ;;  %v735_v32 = vshll.u32 %v734_v30, 16 }
 0x532   : > { %v743_v27 = vpop.xlane.xlu1 %742 }
 0x533   : > { %vm744_vm4 = vcmp.eq.f32.partialorder %v741_v18, %v743_v27  ;;  %v749_v35 = vcvt.f32.s32 %v743_v27 }
 0x534   : > { %v745_v29 = vsel %vm744_vm4, %v740_v28, -inf  ;;  %vm953_vm4 = vcmask 130048  }
 0x535   : > { %746 = vmax.xlane.f32.xlu1 %v745_v29  ;;  %v750_v40 = vshll.u32 %v749_v35, 16  ;;  %v1105_v35 = vld [vmem:[%s1805_s3] ss:$0 sm:$0xff] }
 0x5b6   : > { %v732_v31 = vpop.xlane.xlu0 %731 }
 0x5b7   : > { %v733_v33 = vcvt.f32.s32 %v732_v31 }
 0x5b9   : > { %v736_v34 = vadd.s32 %v735_v32, %v733_v33 }
 0x5bb   : > { %vm752_vm5 = vcmp.eq.s32.totalorder %v720_v4, %v736_v34 }
 0x5bc   : > { %v754_v36 = vsel %vm752_vm5, 2147483648, %v720_v4 }
 0x5bd   : > { %v756_v37 = vsel %vm435_vm2, %v754_v36, 2147483648 }
 0x5be   : > { %v747_v38 = vpop.xlane.xlu1 %746  ;;  %v758_v39 = vshra.s32 %v756_v37, 16  ;;  %v757_v50 = vand.u32 65535, %v756_v37 }
 0x5bf   : > { %v748_v42 = vcvt.f32.s32 %v747_v38 }
 0x5c0   : > { %v760_v44 = vcvt.s32.f32 %v758_v39  ;;  %v759_v52 = vcvt.s32.f32 %v757_v50  ;;  %v1110_v50 = vld [vmem:[%s1807_s5] ss:$0 sm:$0xff] }
 0x5c1   : > { %v751_v45 = vadd.s32 %v750_v40, %v748_v42 }
 0x5c2   : > { %761 = vmax.xlane.f32.xlu0 %v760_v44 }
 0x5c3   : > { %vm753_vm6 = vcmp.eq.s32.totalorder %v721_v15, %v751_v45 }
 0x5c4   : > { %v755_v46 = vsel %vm753_vm6, 2147483648, %v721_v15 }
 0x5c5   : > { %v771_v47 = vsel %vm435_vm2, %v755_v46, 2147483648 }
 0x5c6   : > { %v773_v48 = vshra.s32 %v771_v47, 16  ;;  %v772_v54 = vand.u32 65535, %v771_v47 }
 0x5c8   : > { %v775_v49 = vcvt.s32.f32 %v773_v48  ;;  %v774_v56 = vcvt.s32.f32 %v772_v54 }
 0x5ca   : > { %776 = vmax.xlane.f32.xlu1 %v775_v49 }
 0x64b   : > { %v762_v51 = vpop.xlane.xlu0 %761 }
 0x64c   : > { %vm763_vm7 = vcmp.eq.f32.partialorder %v760_v44, %v762_v51  ;;  %v768_v58 = vcvt.f32.s32 %v762_v51 }
 0x64d   : > { %v764_v53 = vsel %vm763_vm7, %v759_v52, -inf }
 0x64e   : > { %765 = vmax.xlane.f32.xlu0 %v764_v53  ;;  %v769_v60 = vshll.u32 %v768_v58, 16  ;;  %v934_v53 = vld [vmem:[#allocation8] sm:$0xff] }
 0x653   : > { %v777_v55 = vpop.xlane.xlu1 %776 }
 0x654   : > { %vm778_vm8 = vcmp.eq.f32.partialorder %v775_v49, %v777_v55  ;;  %v783_v63 = vcvt.f32.s32 %v777_v55 }
 0x655   : > { %v779_v57 = vsel %vm778_vm8, %v774_v56, -inf }
 0x656   : > { %780 = vmax.xlane.f32.xlu1 %v779_v57  ;;  %v784_v4 = vshll.u32 %v783_v63, 16 }
 0x6d7   : > { %v766_v59 = vpop.xlane.xlu0 %765 }
 0x6d8   : > { %v767_v61 = vcvt.f32.s32 %v766_v59  ;;  %v935_v59 = vld [vmem:[#allocation8 + $0x8] sm:$0xff] }
 0x6da   : > { %v770_v62 = vadd.s32 %v769_v60, %v767_v61 }
 0x6dc   : > { %vm786_vm9 = vcmp.eq.s32.totalorder %v754_v36, %v770_v62 }
 0x6dd   : > { %v788_v0 = vsel %vm786_vm9, 2147483648, %v754_v36 }
 0x6de   : > { %v790_v1 = vsel %vm435_vm2, %v788_v0, 2147483648 }
 0x6df   : > { %v781_v2 = vpop.xlane.xlu1 %780  ;;  %v792_v3 = vshra.s32 %v790_v1, 16  ;;  %v791_v18 = vand.u32 65535, %v790_v1 }
 0x6e0   : > { %v782_v5 = vcvt.f32.s32 %v781_v2 }
 0x6e1   : > { %v794_v6 = vcvt.s32.f32 %v792_v3  ;;  %v793_v20 = vcvt.s32.f32 %v791_v18 }
 0x6e2   : > { %v785_v7 = vadd.s32 %v784_v4, %v782_v5 }
 0x6e3   : > { %795 = vmax.xlane.f32.xlu0 %v794_v6 }
 0x6e4   : > { %vm787_vm10 = vcmp.eq.s32.totalorder %v755_v46, %v785_v7 }
 0x6e5   : > { %v789_v8 = vsel %vm787_vm10, 2147483648, %v755_v46  ;;  %v1109_v46 = vld [vmem:[%s1806_s4] ss:$0 sm:$0xff] }
 0x6e6   : > { %v805_v13 = vsel %vm435_vm2, %v789_v8, 2147483648 }
 0x6e7   : > { %437 = vadd.xlane.f32.xlu0 %v436_v9  ;;  %v807_v14 = vshra.s32 %v805_v13, 16  ;;  %v806_v41 = vand.u32 65535, %v805_v13 }
 0x6e9   : > { %v809_v15 = vcvt.s32.f32 %v807_v14  ;;  %v808_v26 = vcvt.s32.f32 %v806_v41 }
 0x6eb   : > { %810 = vmax.xlane.f32.xlu1 %v809_v15 }
 0x6ef   : > { %553 = vadd.xlane.f32.xlu1 %v552_v16 }
 0x76c   : > { %v796_v19 = vpop.xlane.xlu0 %795 }
 0x76d   : > { %vm797_vm11 = vcmp.eq.f32.partialorder %v794_v6, %v796_v19  ;;  %v802_v43 = vcvt.f32.s32 %v796_v19 }
 0x76e   : > { %v798_v24 = vsel %vm797_vm11, %v793_v20, -inf }
 0x76f   : > { %799 = vmax.xlane.f32.xlu0 %v798_v24  ;;  %v803_v31 = vshll.u32 %v802_v43, 16 }
 0x770   : > { %v438_v28 = vpop.xlane.xlu0 %437 }
 0x774   : > { %v811_v25 = vpop.xlane.xlu1 %810 }
 0x775   : > { %vm812_vm12 = vcmp.eq.f32.partialorder %v809_v15, %v811_v25  ;;  %v817_v34 = vcvt.f32.s32 %v811_v25 }
 0x776   : > { %v813_v27 = vsel %vm812_vm12, %v808_v26, -inf }
 0x777   : > { %814 = vmax.xlane.f32.xlu1 %v813_v27  ;;  %v818_v40 = vshll.u32 %v817_v34, 16 }
 0x778   : > { %v554_v29 = vpop.xlane.xlu1 %553 }
 0x785   : > { %844 = vperm.xlu0 %1255, %v438_v28  }
 0x788   : > { %849 = vperm.xlu1 %1256, %v554_v29  }
 0x7f8   : > { %v800_v30 = vpop.xlane.xlu0 %799 }
 0x7f9   : > { %v801_v32 = vcvt.f32.s32 %v800_v30 }
 0x7fb   : > { %v804_v33 = vadd.s32 %v803_v31, %v801_v32 }
 0x7fd   : > { %vm820_vm13 = vcmp.eq.s32.totalorder %v788_v0, %v804_v33 }
 0x7fe   : > { %v822_v36 = vsel %vm820_vm13, 2147483648, %v788_v0 }
 0x7ff   : > { %vm824_vm14 = vcmp.eq.s32.totalorder %v822_v36, 2147483648 }
 0x800   : > { %v845_v37 = vpop.permute.xlu0 %844  ;;  %v815_v38 = vpop.xlane.xlu1 %814  ;;  %v826_v39 = vsel %vm824_vm14, %v1691_v12, 0.0 }
 0x801   : > { %v858_v42 = vmul.f32 %v1105_v35, %v845_v37  ;;  %v816_v44 = vcvt.f32.s32 %v815_v38  ;;  %v828_v45 = vsel %vm435_vm2, %v826_v39, 0.0 }
 0x802   : > { %829 = vadd.xlane.f32.xlu1 %v828_v45 }
 0x803   : > { %v910_v47 = vadd.f32 %v1727_v23, %v858_v42  ;;  %v819_v48 = vadd.s32 %v818_v40, %v816_v44 }
 0x804   : > { %v850_v49 = vpop.permute.xlu1 %849 }
 0x805   : > { %v923_v51 = vmul.f32 %v1109_v46, %v910_v47  ;;  %v859_v12 = vmul.f32 %v1105_v35, %v850_v49  ;;  %vm821_vm15 = vcmp.eq.s32.totalorder %v789_v8, %v819_v48 }
 0x806   : > { %v823_v52 = vsel %vm821_vm15, 2147483648, %v789_v8 }
 0x807   : > { %v913_v54 = vadd.f32 %v1729_v21, %v859_v12  ;;  %vm825_vm0 = vcmp.eq.s32.totalorder %v823_v52, 2147483648  ;;  %v932_v55 = vadd.f32 %v1110_v50, %v923_v51  ;;  %v947_v21 = vshrl.u32 %v613_v10, 7 }
 0x808   : > { %v827_v56 = vsel %vm825_vm0, %v1700_v22, 0.0 }
 0x809   : > { %v924_v57 = vmul.f32 %v1109_v46, %v913_v54  ;;  %v831_v23 = vsel %vm435_vm2, %v827_v56, 0.0  ;;  %v936_v58 = vmul.f32 %v934_v53, %v932_v55  ;;  %v948_v3 = vadd.s32 8, %v947_v21 }
 0x80a   : > { %832 = vadd.xlane.f32.xlu0 %v831_v23  ;;  %vm949_vm2 = vcmp.eq.s32.totalorder %v947_v21, %v1689_v11 }
 0x80b   : > { %v938_v60 = vsel %vm385_vm1, %v936_v58, 0.0  ;;  %v933_v61 = vadd.f32 %v1110_v50, %v924_v57  ;;  %vm950_vm3 = vcmp.eq.s32.totalorder %v948_v3, %v1689_v11  ;;  %v963_v11 = vld [vmem:[%s1809_s7] sm:$0x1] }
 0x80c   : > { %939 = vadd.xlane.f32.xlu1 %v938_v60 }
 0x80d   : > { %v937_v62 = vmul.f32 %v935_v59, %v933_v61 }
 0x80f   : > { %v941_v63 = vsel %vm385_vm1, %v937_v62, 0.0  ;;  %vm966_vm1 = vcmask 122880  }
 0x810   : > { %942 = vadd.xlane.f32.xlu1 %v941_v63 }
 0x88b   : > { %v830_v0 = vpop.xlane.xlu1 %829 }
 0x88c   : > { %v834_v1 = vmul.f32 0.16666667, %v830_v0 }
 0x893   : > { %v833_v2 = vpop.xlane.xlu0 %832 }
 0x894   : > { %v835_v5 = vmul.f32 0.16666667, %v833_v2 }
 0x895   : > { %v940_v22 = vpop.xlane.xlu1 %939 }
 0x896   : > { %v944_v4 = vadd.f32 %v940_v22, %v834_v1 }
 0x898   : > { %v951_v7 = vsel %vm949_vm2, %v944_v4, 0.0 }
 0x899   : > { %v943_v6 = vpop.xlane.xlu1 %942  ;;  %v954_v13 = vsel %vm953_vm4, %v951_v7, 0.0 }
 0x89a   : > { %v945_v8 = vadd.f32 %v943_v6, %v835_v5 }
 0x89c   : > { %v952_v9 = vsel %vm950_vm3, %v945_v8, 0.0 }
 0x89d   : > { %v955_v14 = vsel %vm953_vm4, %v952_v9, 0.0 }
 0x89e   : > { %v956_v10 = vadd.f32 %v955_v14, %v954_v13 }
 0x8a0   : > { %v957_v15 = vrot.slane %v956_v10, 4 }
 0x8a2   : > { %v958_v16 = vadd.f32 %v957_v15, %v956_v10 }
 0x8a4   : > { %v959_v17 = vrot.slane %v958_v16, 2 }
 0x8a6   : > { %v960_v18 = vadd.f32 %v959_v17, %v958_v16 }
 0x8a8   : > { %v961_v19 = vrot.slane %v960_v18, 1 }
 0x8aa   : > { %v962_v20 = vadd.f32 %v961_v19, %v960_v18 }
 0x8ac   : > { %v964_v24 = vadd.f32 %v963_v11, %v962_v20 }
 0x8ae   : > { %v965_v41 = vmul.f32 0.5, %v964_v24 }
 0x8b0   : > { %967 = vst.msk [vmem:[%s365_s26] sm:$0x1] %vm966_vm1, %v965_v41 }
 0x8b1   : > { %1390 = shalt.err (!%p1387_p6)
}
 0x8b2   : > { %s1391_s23 = scalar_lea.hbm %s979_s17, 16  ;;  %s1395_s21 = scalar_lea.hbm %s1810_s8, 32 }
 0x8b3   : > { %p1392_p4 = scmp.ne.s32.totalorder %s979_s17, %s1391_s23  ;;  %p1396_p11 = scmp.lt.s32.totalorder %s979_s17, %s1810_s8 }
 0x8b4   : > { %p1397_p9 = scmp.lt.s32.totalorder %s1395_s21, %s1391_s23 }
 0x8b5   : > { %p1393_p1 = pnand %p1392_p4, %p1836_p5 }
 0x8b6   : > { %p1398_p3 = por %p1397_p9, %p1396_p11 }
 0x8b7   : > { %p1394_p8 = pneg %p1393_p1 }
 0x8b9   : > { %p1399_p12 = pnand %p1398_p3, %p1394_p8 }
 0x8bb   : > { %1402 = shalt.err (!%p1399_p12)
}
 0x8bc   : > { %1185 = dma.vmem_to_hbm [thread:$0]  (%p1836_p5), %s982_s16, 16, %s979_s17, %s969_s11  }
 0x8bd PF: > { %s993_s26 = sand.u32 1, %s1437_s27   ;;  %p1837_p7 = scmp.ne.s32.totalorder %s1820_s12, 0 }
 0x8be   : > { %p1838_p10 = scmp.ge.s32.totalorder %s1449_s30, 2  ;;  %s994_s2 = scalar_lea.sflag [#allocation4], %s993_s26 }
 0x8c0   : > { %p1202_p13 = pnand %p1838_p10, %p1837_p7 }
 0x8c2   : > { %p1203_p0 = pneg %p1202_p13 }
 0x8c4   : > { %1432 = dma.done.wait (%p1203_p0), %s994_s2, 16  }
 0x8c5   : > { %1434 = vsyncadd (%p1203_p0), %s994_s2, 4294967280  ;;  %p23_p2 = scmp.ge.s32.totalorder %s1591_s22, 4   ;;  %s1839_s27 = smov %s1441_s28 }
 0x8c6   : > { %s1840_s28 = smov %s1445_s29  ;;  %s1841_s29 = smov %s1601_s10 }
 0x8c7   : > { %s1842_s30 = smov %s1591_s22  ;;  %25 = sbr.rel (!%p23_p2) target bundleno = 10 (0xa), region = 110 }
 0x8cc   :  { %998 = vsyncpa [#allocation3], 1 }
 0x8cd   :  { %1000 = vsyncpa [#allocation3 + $0x1], 1 }
 0x8ce   :  { %1001 = vsyncpa [#allocation6], 1 }
 0x8cf   :  { %1002 = vsyncpa [#allocation9], 1 }
 0x8d0   :  { %1003 = vsyncpa [#allocation4], 1 }
 0x8d1   :  { %1005 = vsyncpa [#allocation4 + $0x1], 1 }

</bundles_post_ra>
